<compile_context>
chip_gen: v5e
topology: v5e:2x2
jax: 0.10.0
libtpu: 0.0.40
codegen_flags: <defaults>
</compile_context>

<pallas_src>
import functools

import jax
import jax.numpy as jnp
from jax import lax
from jax.experimental import pallas as pl
from jax.experimental.pallas import tpu as pltpu


def vscores_kernel(embed_ref, w_ref, vs_ref):
    # embed_ref: VMEM [TV, D] f32 (vocab tile of the table)
    # w_ref    : VMEM [1, D]  f32 (Linear weight row, constant block)
    # vs_ref   : VMEM [TV, 1] f32 (per-token fused-linear scores)
    # VPU multiply + XLU lane reduce; MXU deliberately not used for an Nx1 contraction.
    vs_ref[...] = jnp.sum(embed_ref[...] * w_ref[...], axis=1, keepdims=True)


def cbow_scores_kernel(ids_t_ref, vs_ref, b_ref, out_ref, *, vocab):
    # grid = (batch tiles ["parallel"], vocab tiles ["arbitrary" reduction])
    # ids_t_ref: VMEM [S, Bb]  int32 (context ids, batch on lanes)
    # vs_ref   : VMEM [TV, 1]  f32   (precomputed per-token scores for this vocab tile)
    # b_ref    : SMEM [1, 1]   f32   (Linear bias)
    # out_ref  : VMEM [1, Bb]  f32   (lane-dense scores; resident across the vocab axis)
    vi = pl.program_id(1)

    @pl.when(vi == 0)
    def _init():
        out_ref[...] = jnp.zeros_like(out_ref)

    S, Bb = ids_t_ref.shape
    TV = vs_ref.shape[0]
    v_base = vi * TV

    ids_t = ids_t_ref[...]                                           # [S, Bb]
    iota_v = lax.broadcasted_iota(jnp.int32, (TV, Bb), 0) + v_base   # [TV, Bb] global token ids

    # counts[v, b] = multiplicity of token (v_base + v) in example b's window.
    # Accumulate in int32; convert to float exactly once after the (small, static) loop.
    counts = jnp.zeros((TV, Bb), jnp.int32)
    for s in range(S):
        counts = counts + (iota_v == ids_t[s:s + 1, :]).astype(jnp.int32)

    vs = vs_ref[...]                                                 # [TV, 1]
    if vocab % TV != 0:
        # Last (padded) vocab tile: the padded v_scores rows hold undefined VMEM; zero them so
        # a stray NaN/inf can never leak through "0 * garbage".
        row = lax.broadcasted_iota(jnp.int32, (TV, 1), 0) + v_base
        vs = jnp.where(row < vocab, vs, 0.0)

    # Sublane reduction of the count-weighted scores for this vocab tile.
    out_ref[...] += jnp.sum(counts.astype(jnp.float32) * vs, axis=0, keepdims=True)

    @pl.when(vi == pl.num_programs(1) - 1)
    def _finish():
        out_ref[...] += b_ref[0, 0]


def _vmem_limit(buffer_bytes):
    # Derived from the actual buffers with 2x headroom; floor avoids a pathologically small
    # limit, cap stays below v7x's 64 MiB physical VMEM.
    return int(min(56 * 1024 * 1024, max(4 * 1024 * 1024, 2 * buffer_bytes)))


def cbow_forward(ids, embed_table, w, b):
    """ids: [B, S] int; embed_table: [vocab, D]; w: [D]; b: scalar. Returns [B] f32 logits."""
    B, S = ids.shape
    vocab, D = embed_table.shape

    ids_t = jnp.transpose(ids.astype(jnp.int32))       # [S, B]: batch on the lane axis
    embed_f32 = embed_table.astype(jnp.float32)        # keep f32 to match torch numerics
    w_row = w.reshape(1, D).astype(jnp.float32)
    bias = jnp.asarray(b, jnp.float32).reshape(1, 1)

    # ---- Stage 1: per-token score table v_scores[v] = e_v . w  ([vocab, 1]) ---------------
    # TODO(synk): for very large vect_size, also tile D as a reduction axis.
    tv1 = vocab if vocab <= 512 else 512
    n_v1 = pl.cdiv(vocab, tv1)
    v_scores = pl.pallas_call(
        vscores_kernel,
        out_shape=jax.ShapeDtypeStruct((vocab, 1), jnp.float32),
        grid=(n_v1,),
        in_specs=[
            pl.BlockSpec((tv1, D), lambda i: (i, 0)),                 # embedding table tile
            pl.BlockSpec((1, D), lambda i: (0, 0)),                   # linear weight row
        ],
        out_specs=pl.BlockSpec((tv1, 1), lambda i: (i, 0)),
        compiler_params=pltpu.CompilerParams(
            dimension_semantics=("parallel",),
            vmem_limit_bytes=_vmem_limit(2 * tv1 * D * 4 + 2 * D * 4 + 2 * tv1 * 4),
        ),
    )(embed_f32, w_row)

    # ---- Stage 2: score[b] = sum_s v_scores[ids[s, b]] + bias ----------------------------
    if B <= 128:
        block_b = B                                    # whole small batch, one lane-dense tile
    elif B <= 1024:
        block_b = 128 * pl.cdiv(pl.cdiv(B, 2), 128)    # >=2 tiles so v7x's 2nd TC gets work
    else:
        block_b = 512                                  # wide lane tiles amortize step overhead
    n_b = pl.cdiv(B, block_b)

    tv2 = vocab if vocab <= 512 else 512
    n_v2 = pl.cdiv(vocab, tv2)

    stage2_bytes = (2 * S * block_b * 4      # ids (double-buffered)
                    + 2 * tv2 * 4            # v_scores tile
                    + 2 * block_b * 4        # output tile
                    + tv2 * block_b * 4)     # counts intermediate
    out = pl.pallas_call(
        functools.partial(cbow_scores_kernel, vocab=vocab),
        out_shape=jax.ShapeDtypeStruct((1, B), jnp.float32),
        grid=(n_b, n_v2),                              # reduction (vocab) axis last
        in_specs=[
            pl.BlockSpec((S, block_b), lambda bi, vi: (0, bi)),        # ids (transposed)
            pl.BlockSpec((tv2, 1), lambda bi, vi: (vi, 0)),            # v_scores tile
            pl.BlockSpec(memory_space=pltpu.MemorySpace.SMEM),         # bias scalar
        ],
        out_specs=pl.BlockSpec((1, block_b), lambda bi, vi: (0, bi)),
        compiler_params=pltpu.CompilerParams(
            dimension_semantics=("parallel", "arbitrary"),
            vmem_limit_bytes=_vmem_limit(stage2_bytes),
        ),
    )(ids_t, v_scores, bias)

    return out[0, :]   # torch .squeeze() on [B, 1] -> [B]


if __name__ == "__main__":
    # Small, deterministic synthetic setup consistent with CBOW.__init__:
    #   vocab_size=64, vect_size=128 (Embedding weight), Linear(vect_size, 1).
    vocab_size = 64
    vect_size = 128
    batch = 8
    seq = 6

    key = jax.random.PRNGKey(0)
    k_emb, k_w, k_b, k_ids = jax.random.split(key, 4)

    pretrained_embed = jax.random.normal(k_emb, (vocab_size, vect_size), dtype=jnp.float32)
    w = jax.random.normal(k_w, (vect_size,), dtype=jnp.float32) * 0.1
    b = jax.random.normal(k_b, (), dtype=jnp.float32) * 0.1
    ids = jax.random.randint(k_ids, (batch, seq), 0, vocab_size, dtype=jnp.int32)

    scores = jax.block_until_ready(cbow_forward(ids, pretrained_embed, w, b))

    # Pure-JAX reference for the exact forward semantics:
    # embed(batch) -> sum over dim 1 -> Linear -> squeeze.
    ref = jnp.take(pretrained_embed, ids, axis=0).sum(axis=1) @ w + b

    assert scores.shape == (batch,)
    assert jnp.allclose(scores, ref, rtol=1e-5, atol=1e-4), (scores, ref)
    # TODO(synk): BCEWithLogitsLoss / SGD step / predict() thresholding are training-time host
    # logic, intentionally not part of this forward kernel.
    print("KERNEL_OK")
</pallas_src>

<mosaic_0001>
module attributes {stable_mosaic.version = 11 : i64} {
  func.func @vscores_kernel(%arg0: i32, %arg1: memref<64x128xf32, #tpu.memory_space<vmem>>, %arg2: memref<1x128xf32, #tpu.memory_space<vmem>>, %arg3: memref<64x1xf32, #tpu.memory_space<vmem>>) attributes {dimension_semantics = [#tpu.dimension_semantics<parallel>], iteration_bounds = array<i64: 1>, scalar_prefetch = 0 : i64, scratch_operands = 0 : i64, tpu.core_type = #tpu.core_type<tc>, window_params = [{transform_indices = @transform_0, window_bounds = array<i64: 64, 128>}, {pipeline_mode = #tpu.pipeline_mode<synchronous>, transform_indices = @transform_1, window_bounds = array<i64: 1, 128>}, {transform_indices = @transform_2, window_bounds = array<i64: 64, 1>}]} {
    %c0 = arith.constant 0 : index
    %c0_0 = arith.constant 0 : index
    %0 = vector.load %arg1[%c0, %c0_0] : memref<64x128xf32, #tpu.memory_space<vmem>>, vector<64x128xf32>
    %c0_1 = arith.constant 0 : index
    %c0_2 = arith.constant 0 : index
    %1 = vector.load %arg2[%c0_1, %c0_2] : memref<1x128xf32, #tpu.memory_space<vmem>>, vector<1x128xf32>
    %2 = vector.broadcast %1 : vector<1x128xf32> to vector<64x128xf32>
    %3 = arith.mulf %0, %2 : vector<64x128xf32>
    %cst = arith.constant dense<0.000000e+00> : vector<64xf32>
    %4 = vector.multi_reduction <add>, %3, %cst [1] : vector<64x128xf32> to vector<64xf32>
    %5 = vector.shape_cast %4 : vector<64xf32> to vector<64x1xf32>
    %c0_3 = arith.constant 0 : index
    %c0_4 = arith.constant 0 : index
    %6 = vector.load %arg3[%c0_3, %c0_4] : memref<64x1xf32, #tpu.memory_space<vmem>>, vector<64x1xf32>
    tpu.vector_store %arg3[%c0_3, %c0_4], %5 {strides = array<i32>} : memref<64x1xf32, #tpu.memory_space<vmem>>, vector<64x1xf32>,
    return
  }
  func.func @transform_0(%arg0: i32) -> (i32, i32) {
    %c0_i32 = arith.constant 0 : i32
    %c0_i32_0 = arith.constant 0 : i32
    return %arg0, %c0_i32 : i32, i32
  }
  func.func @transform_1(%arg0: i32) -> (i32, i32) {
    %c0_i32 = arith.constant 0 : i32
    %c0_i32_0 = arith.constant 0 : i32
    %c0_i32_1 = arith.constant 0 : i32
    return %c0_i32, %c0_i32_0 : i32, i32
  }
  func.func @transform_2(%arg0: i32) -> (i32, i32) {
    %c0_i32 = arith.constant 0 : i32
    %c0_i32_0 = arith.constant 0 : i32
    return %arg0, %c0_i32 : i32, i32
  }
}

</mosaic_0001>

<bundles_post_ra>
// kernel: tpu_custom_call.1
= control target key start
LH: loop header
LB: loop body
LE: loop exit
PB: predicated region body
PF: predicated region fallthrough
CT: control target
= control target key end

     0   :  { %7 = vsyncpa [#allocation3], 0  ;;  %s206_s0 = inlined_call_operand.hbm [shape: f32[64,128], index: 0, kind: input, shape index: {}]   ;;  %s207_s1 = inlined_call_operand.hbm [shape: f32[1,128], index: 1, kind: input, shape index: {}]   ;;  %s208_s2 = inlined_call_operand.vmem [shape: f32[64,1], index: 2, kind: output, shape index: {}]  }
   0x1   :  { %s13_s11 = sshll.u32 %s206_s0, 4  ;;  %s14_s11 = int_to_ptr.hbm [resolvable:$true] %s13_s11 }
   0x2   :  { %8 = vsyncpa [#allocation5], 0  ;;  %s149_s12 = smov [#allocation2]   ;;  %s27_s16 = sshll.u32 %s207_s1, 4  ;;  %s28_s16 = int_to_ptr.hbm [resolvable:$true] %s27_s16 }
   0x3   :  { %s15_s13 = sshll.u32 %s149_s12, 4  ;;  %s150_s17 = smov 128   ;;  %s16_s13 = int_to_ptr.vmem [resolvable:$true] %s15_s13 }
   0x4   :  { %s151_s18 = smov 8   ;;  %s152_s19 = smov [#allocation4]  }
   0x5   :  { %21 = dma.hbm_to_vmem [thread:$0]  %s14_s11, 1024, %s16_s13, [#allocation3], %s150_s17, %s150_s17, %s151_s18  }
   0x6   :  { %s29_s20 = sshll.u32 %s152_s19, 4  ;;  %s30_s20 = int_to_ptr.vmem [resolvable:$true] %s29_s20 }
   0x7   :  { %32 = dma.hbm_to_vmem [thread:$0]  %s28_s16, 16, %s30_s20, [#allocation5]  }
   0x8   :  { %145 = dma.done.wait [#allocation3], 1024  }
   0x9   :  { %146 = vsyncadd [#allocation3], 4294966272 }
   0xa   :  { %147 = dma.done.wait [#allocation5], 16  }
   0xb   :  { %148 = vsyncadd [#allocation5], 4294967280  ;;  %v43_v0 = vld [vmem:[#allocation2 + $0x10] sm:$0xff]  ;;  %v96_v1 = vld [vmem:[#allocation4] ss:$0 sm:$0xff]  ;;  %vm77_vm0 = vcmask 7168  }
   0xc   :  { %v41_v2 = vld [vmem:[#allocation2] sm:$0xff]  ;;  %v55_v4 = vmul.f32 %v96_v1, %v43_v0  ;;  %v44_v7 = vld [vmem:[#allocation2 + $0x18] sm:$0xff]  ;;  %v42_v8 = vld [vmem:[#allocation2 + $0x8] sm:$0xff] }
   0xd   :  { %v45_v3 = vld [vmem:[#allocation2 + $0x20] sm:$0xff]  ;;  %v53_v5 = vmul.f32 %v96_v1, %v41_v2  ;;  %v46_v9 = vld [vmem:[#allocation2 + $0x28] sm:$0xff]  ;;  %v56_v10 = vmul.f32 %v96_v1, %v44_v7  ;;  %v54_v11 = vmul.f32 %v96_v1, %v42_v8  ;;  %v48_v13 = vld [vmem:[#allocation2 + $0x38] sm:$0xff] }
   0xe   :  { %v57_v6 = vmul.f32 %v96_v1, %v45_v3  ;;  %65 = vadd.xlane.f32.xlu1 %v55_v4  ;;  %v58_v12 = vmul.f32 %v96_v1, %v46_v9  ;;  %v47_v14 = vld [vmem:[#allocation2 + $0x30] sm:$0xff]  ;;  %v60_v15 = vmul.f32 %v96_v1, %v48_v13 }
   0xf   :  { %61 = vadd.xlane.f32.xlu0 %v53_v5  ;;  %v59_v16 = vmul.f32 %v96_v1, %v47_v14 }
  0x10   :  { %69 = vadd.xlane.f32.xlu2 %v57_v6 }
  0x16   :  { %67 = vadd.xlane.f32.xlu1 %v56_v10 }
  0x17   :  { %63 = vadd.xlane.f32.xlu0 %v54_v11 }
  0x18   :  { %71 = vadd.xlane.f32.xlu2 %v58_v12 }
  0x1e   :  { %75 = vadd.xlane.f32.xlu1 %v60_v15 }
  0x1f   :  { %73 = vadd.xlane.f32.xlu0 %v59_v16 }
  0x81   :  { %v66_v17 = vpop.xlane.xlu1 %65 }
  0x82   :  { %v62_v18 = vpop.xlane.xlu0 %61  ;;  %80 = vst.msk [vmem:[%s208_s2 + $0x10] sm:$0xff] %vm77_vm0, %v66_v17 }
  0x83   :  { %v70_v19 = vpop.xlane.xlu2 %69  ;;  %78 = vst.msk [vmem:[%s208_s2] sm:$0xff] %vm77_vm0, %v62_v18 }
  0x84   :  { %82 = vst.msk [vmem:[%s208_s2 + $0x20] sm:$0xff] %vm77_vm0, %v70_v19 }
  0x89   :  { %v68_v20 = vpop.xlane.xlu1 %67 }
  0x8a   :  { %v64_v21 = vpop.xlane.xlu0 %63  ;;  %81 = vst.msk [vmem:[%s208_s2 + $0x18] sm:$0xff] %vm77_vm0, %v68_v20 }
  0x8b   :  { %v72_v22 = vpop.xlane.xlu2 %71  ;;  %79 = vst.msk [vmem:[%s208_s2 + $0x8] sm:$0xff] %vm77_vm0, %v64_v21 }
  0x8c   :  { %83 = vst.msk [vmem:[%s208_s2 + $0x28] sm:$0xff] %vm77_vm0, %v72_v22 }
  0x91   :  { %v76_v23 = vpop.xlane.xlu1 %75 }
  0x92   :  { %v74_v24 = vpop.xlane.xlu0 %73  ;;  %85 = vst.msk [vmem:[%s208_s2 + $0x38] sm:$0xff] %vm77_vm0, %v76_v23 }
  0x93   :  { %84 = vst.msk [vmem:[%s208_s2 + $0x30] sm:$0xff] %vm77_vm0, %v74_v24 }
  0x94   :  { %90 = vsyncpa [#allocation3], 1 }
  0x95   :  { %91 = vsyncpa [#allocation5], 1 }

</bundles_post_ra>
